<compile_context>
chip_gen: v7x
topology: tpu7x:2x2x1
jax: 0.10.0
libtpu: 0.0.40
codegen_flags: <defaults>
</compile_context>

<pallas_src>
import math

import jax
import jax.numpy as jnp
from jax import lax
from jax.experimental import pallas as pl
from jax.experimental.pallas import tpu as pltpu

N_CLASSES = 2        # Loss1(n=2) default
_TILE_BYTES = 1 << 20  # ~1 MiB per input buffer (>=85% of HBM roofline per tile sweep)


def _make_kernel(alf, n_rows, tile_rows, lane_w, inner_blocks, needs_row_mask):
    """Streaming accumulation kernel over a (n_rows, lane_w) slab.

    Grid = (2 cores, inner row-blocks).  Outputs are per-core (8, lane_w) f32
    partial accumulators (A, S2, per-lane column sums) kept VMEM-resident across
    the inner ("arbitrary") axis.
    """
    alf = float(alf)
    groups = tile_rows // 8  # tile_rows is always a multiple of 8

    def kernel(yp_ref, yt_ref, a_ref, s2_ref, col_ref):
        t = pl.program_id(1)

        @pl.when(t == 0)
        def _init():
            a_ref[...] = jnp.zeros_like(a_ref)
            s2_ref[...] = jnp.zeros_like(s2_ref)
            col_ref[...] = jnp.zeros_like(col_ref)

        # Load in native dtype, cast to f32 in-register.
        yp = yp_ref[...].astype(jnp.float32)
        yt = yt_ref[...].astype(jnp.float32)

        if needs_row_mask:
            # Nominal (unclamped) row offset of this (core, step).  Rows >= n_rows
            # are either the ragged tail of the last block or a fully redundant
            # overhang block (whose index_map was clamped) -> zero them so they
            # contribute nothing (and any OOB garbage/NaN is dropped).
            o = pl.program_id(0)
            row0 = (o * inner_blocks + t) * tile_rows
            rows = lax.broadcasted_iota(jnp.int32, (tile_rows, lane_w), 0) + row0
            valid = rows < n_rows
            yp = jnp.where(valid, yp, 0.0)
            yt = jnp.where(valid, yt, 0.0)

        diff = yp - alf * yt
        # Fold the tile's row-groups into the (8, lane_w) vreg-shaped accumulators.
        # The (tile_rows, W) -> (groups, 8, W) reshape is layout-free and the
        # axis-0 sum is pure VPU vadds; the single cross-lane reduction happens
        # once, outside the kernel, on the tiny partials.
        a_ref[...] += jnp.sum((diff * diff).reshape(groups, 8, lane_w), axis=0)
        s2_ref[...] += jnp.sum((yp * yp).reshape(groups, 8, lane_w), axis=0)
        col_ref[...] += jnp.sum(yp.reshape(groups, 8, lane_w), axis=0)

    return kernel


def _loss1_impl(yp, yt, alf, lam):
    B, N = yp.shape
    assert yt.shape == (B, N), (yp.shape, yt.shape)
    total = B * N

    # Lane-dense layout: view the row-major (B, N) buffer as a (R, W) slab with
    # W a multiple of both 128 (lanes) and N, so class(flat index k) = lane % N.
    W = math.lcm(N, 128)
    gran = 8 * W  # keep R a multiple of 8 -> only full-sublane-group edge blocks
    padded = pl.cdiv(total, gran) * gran
    flat_p = yp.reshape(-1)  # contiguous -> no-copy reshape
    flat_t = yt.reshape(-1)
    if padded != total:
        # One pad copy only for shapes not aligned to 8*W elements (e.g. B % 512
        # for N=2).  Zero padding is exact: it contributes 0 to every accumulated
        # sum, and the B*alf^2 term below uses the true batch size.
        # TODO(synk): a manual-DMA tail path could remove this copy as well.
        flat_p = jnp.pad(flat_p, (0, padded - total))
        flat_t = jnp.pad(flat_t, (0, padded - total))
    R = padded // W
    yp2 = flat_p.reshape(R, W)
    yt2 = flat_t.reshape(R, W)

    # Row-block size: ~1 MiB per input buffer, multiple of 8, never larger than R.
    itemsize = jnp.dtype(yp.dtype).itemsize
    tr = max(8, min(R, (_TILE_BYTES // (W * itemsize)) // 8 * 8))
    nb = pl.cdiv(R, tr)   # total row-blocks
    ib = pl.cdiv(nb, 2)   # row-blocks per core (outer "parallel" index)
    # Mask-free fast path when every nominal block is full and in range.
    needs_row_mask = not (R % tr == 0 and nb % 2 == 0)

    kernel = _make_kernel(alf, R, tr, W, ib, needs_row_mask)

    def in_map(o, t):
        # Clamp so the DMA'd block index is always in range; the redundant
        # overhang block (only when nb is odd) is zeroed by the in-kernel mask,
        # which uses the *unclamped* row offset, so nothing is double counted.
        return (jnp.minimum(o * ib + t, nb - 1), 0)

    part = jax.ShapeDtypeStruct((2, 8, W), jnp.float32)
    part_spec = pl.BlockSpec((None, 8, W), lambda o, t: (o, 0, 0))

    a_out, s2_out, col_out = pl.pallas_call(
        kernel,
        out_shape=(part, part, part),
        grid_spec=pltpu.PrefetchScalarGridSpec(
            num_scalar_prefetch=0,
            grid=(2, ib),
            in_specs=[
                pl.BlockSpec((tr, W), in_map),  # yp slab
                pl.BlockSpec((tr, W), in_map),  # yt slab
            ],
            out_specs=[part_spec, part_spec, part_spec],
        ),
        compiler_params=pltpu.CompilerParams(
            # Outer axis splits the batch across v7x's two TensorCores;
            # inner axis carries the resident accumulators.
            dimension_semantics=("parallel", "arbitrary"),
            vmem_limit_bytes=32 * 1024 * 1024,
        ),
    )(yp2, yt2)

    # Tiny epilogue (O(W + N) work) combining the per-core partials.
    inv_n = 1.0 / float(N)
    A = jnp.sum(a_out)                          # sum((yp - alf*yt)^2)
    S2 = jnp.sum(s2_out)                        # sum(yp^2)
    col_lane = jnp.sum(col_out, axis=(0, 1))    # (W,) per-lane sums of yp
    colsum = jnp.sum(col_lane.reshape(W // N, N), axis=0)  # (N,) per-class sums

    La = A * inv_n
    d = (S2 - 2.0 * float(alf) * colsum + float(B) * float(alf) ** 2) * inv_n
    s = jnp.sum(jnp.exp(La - d))
    Lt = jnp.log1p(s)                           # == log(1 + s), more accurate
    L = Lt + float(lam) * La
    L = jnp.where(L < 1.5, L * 1.8, L)
    return 1.5 * L


# Public entry point: alf / lam are compile-time constants of the kernel.
loss1 = jax.jit(_loss1_impl, static_argnums=(2, 3))


def loss1_ref(yp, yt, alf, lam):
    """Pure-JAX reference mirroring the PyTorch forward (direct form)."""
    B, N = yp.shape

    def dla(a, b):
        return jnp.mean((a - b) ** 2) * B

    La = dla(yp, alf * yt)
    C = jnp.eye(N, dtype=jnp.float32)
    s = jnp.float32(0.0)
    for i in range(N):
        s = s + jnp.exp(La - dla(yp, alf * C[i]))
    Lt = jnp.log(1.0 + s)
    L = Lt + lam * La
    L = jnp.where(L < 1.5, L * 1.8, L)
    return 1.5 * L


if __name__ == "__main__":
    key = jax.random.PRNGKey(0)
    k1, k2 = jax.random.split(key)

    B, N = 8, N_CLASSES
    yp = jax.random.normal(k1, (B, N), dtype=jnp.float32)      # predictions
    labels = jax.random.randint(k2, (B,), 0, N)
    yt = jax.nn.one_hot(labels, N, dtype=jnp.float32)          # one-hot targets

    alf, lam = 0.7, 0.9  # deterministic hyperparameters (module __init__ args)

    out = loss1(yp, yt, alf, lam)
    jax.block_until_ready(out)

    ref = loss1_ref(yp, yt, alf, lam)
    assert jnp.allclose(out, ref, rtol=1e-5, atol=1e-5), (out, ref)

    print("KERNEL_OK")
</pallas_src>

<mosaic_0001>
module attributes {stable_mosaic.version = 11 : i64} {
  func.func @kernel(%arg0: i32, %arg1: i32, %arg2: memref<8x128xf32, #tpu.memory_space<vmem>>, %arg3: memref<8x128xf32, #tpu.memory_space<vmem>>, %arg4: memref<1x8x128xf32, #tpu.memory_space<vmem>>, %arg5: memref<1x8x128xf32, #tpu.memory_space<vmem>>, %arg6: memref<1x8x128xf32, #tpu.memory_space<vmem>>) attributes {dimension_semantics = [#tpu.dimension_semantics<parallel>, #tpu.dimension_semantics<arbitrary>], iteration_bounds = array<i64: 2, 1>, scalar_prefetch = 0 : i64, scratch_operands = 0 : i64, tpu.core_type = #tpu.core_type<tc>, window_params = [{transform_indices = @transform_0, window_bounds = array<i64: 8, 128>}, {transform_indices = @transform_1, window_bounds = array<i64: 8, 128>}, {transform_indices = @transform_2, window_bounds = array<i64: 1, 8, 128>}, {transform_indices = @transform_3, window_bounds = array<i64: 1, 8, 128>}, {transform_indices = @transform_4, window_bounds = array<i64: 1, 8, 128>}]} {
    %c0_i32 = arith.constant 0 : i32
    %0 = arith.cmpi eq, %arg1, %c0_i32 : i32
    %1 = arith.extui %0 : i1 to i32
    %c0_i32_0 = arith.constant 0 : i32
    %2 = arith.cmpi ne, %1, %c0_i32_0 : i32
    scf.if %2 {
      %cst_28 = arith.constant 0.000000e+00 : f32
      %46 = vector.broadcast %cst_28 : f32 to vector<8x128xf32>
      %c0_29 = arith.constant 0 : index
      %c0_30 = arith.constant 0 : index
      %c0_31 = arith.constant 0 : index
      %47 = vector.load %arg4[%c0_29, %c0_30, %c0_31] : memref<1x8x128xf32, #tpu.memory_space<vmem>>, vector<1x8x128xf32>
      %48 = vector.shape_cast %47 : vector<1x8x128xf32> to vector<8x128xf32>
      %49 = vector.shape_cast %46 : vector<8x128xf32> to vector<1x8x128xf32>
      tpu.vector_store %arg4[%c0_29, %c0_30, %c0_31], %49 {strides = array<i32>} : memref<1x8x128xf32, #tpu.memory_space<vmem>>, vector<1x8x128xf32>,
      %cst_32 = arith.constant 0.000000e+00 : f32
      %50 = vector.broadcast %cst_32 : f32 to vector<8x128xf32>
      %c0_33 = arith.constant 0 : index
      %c0_34 = arith.constant 0 : index
      %c0_35 = arith.constant 0 : index
      %51 = vector.load %arg5[%c0_33, %c0_34, %c0_35] : memref<1x8x128xf32, #tpu.memory_space<vmem>>, vector<1x8x128xf32>
      %52 = vector.shape_cast %51 : vector<1x8x128xf32> to vector<8x128xf32>
      %53 = vector.shape_cast %50 : vector<8x128xf32> to vector<1x8x128xf32>
      tpu.vector_store %arg5[%c0_33, %c0_34, %c0_35], %53 {strides = array<i32>} : memref<1x8x128xf32, #tpu.memory_space<vmem>>, vector<1x8x128xf32>,
      %cst_36 = arith.constant 0.000000e+00 : f32
      %54 = vector.broadcast %cst_36 : f32 to vector<8x128xf32>
      %c0_37 = arith.constant 0 : index
      %c0_38 = arith.constant 0 : index
      %c0_39 = arith.constant 0 : index
      %55 = vector.load %arg6[%c0_37, %c0_38, %c0_39] : memref<1x8x128xf32, #tpu.memory_space<vmem>>, vector<1x8x128xf32>
      %56 = vector.shape_cast %55 : vector<1x8x128xf32> to vector<8x128xf32>
      %57 = vector.shape_cast %54 : vector<8x128xf32> to vector<1x8x128xf32>
      tpu.vector_store %arg6[%c0_37, %c0_38, %c0_39], %57 {strides = array<i32>} : memref<1x8x128xf32, #tpu.memory_space<vmem>>, vector<1x8x128xf32>,
    } else {
    }
    %c0 = arith.constant 0 : index
    %c0_1 = arith.constant 0 : index
    %3 = vector.load %arg2[%c0, %c0_1] : memref<8x128xf32, #tpu.memory_space<vmem>>, vector<8x128xf32>
    %c0_2 = arith.constant 0 : index
    %c0_3 = arith.constant 0 : index
    %4 = vector.load %arg3[%c0_2, %c0_3] : memref<8x128xf32, #tpu.memory_space<vmem>>, vector<8x128xf32>
    %c1_i32 = arith.constant 1 : i32
    %5 = arith.muli %arg0, %c1_i32 : i32
    %6 = arith.addi %5, %arg1 : i32
    %c8_i32 = arith.constant 8 : i32
    %7 = arith.muli %6, %c8_i32 : i32
    %8 = tpu.iota {dimensions = array<i32: 0>} : vector<8x128xi32>
    %9 = vector.broadcast %7 : i32 to vector<8x128xi32>
    %10 = arith.addi %8, %9 : vector<8x128xi32>
    %c8_i32_4 = arith.constant 8 : i32
    %11 = vector.broadcast %c8_i32_4 : i32 to vector<8x128xi32>
    %12 = arith.cmpi slt, %10, %11 : vector<8x128xi32>
    %cst = arith.constant 0.000000e+00 : f32
    %13 = vector.broadcast %cst : f32 to vector<8x128xf32>
    %14 = arith.select %12, %3, %13 : vector<8x128xi1>, vector<8x128xf32>
    %cst_5 = arith.constant 0.000000e+00 : f32
    %15 = vector.broadcast %cst_5 : f32 to vector<8x128xf32>
    %16 = arith.select %12, %4, %15 : vector<8x128xi1>, vector<8x128xf32>
    %cst_6 = arith.constant 0.699999988 : f32
    %17 = vector.broadcast %cst_6 : f32 to vector<8x128xf32>
    %18 = arith.mulf %17, %16 : vector<8x128xf32>
    %19 = arith.subf %14, %18 : vector<8x128xf32>
    %c0_7 = arith.constant 0 : index
    %c0_8 = arith.constant 0 : index
    %c0_9 = arith.constant 0 : index
    %20 = vector.load %arg4[%c0_7, %c0_8, %c0_9] : memref<1x8x128xf32, #tpu.memory_space<vmem>>, vector<1x8x128xf32>
    %21 = vector.shape_cast %20 : vector<1x8x128xf32> to vector<8x128xf32>
    %22 = arith.mulf %19, %19 : vector<8x128xf32>
    %23 = vector.shape_cast %22 : vector<8x128xf32> to vector<1x8x128xf32>
    %cst_10 = arith.constant dense<0.000000e+00> : vector<8x128xf32>
    %24 = vector.multi_reduction <add>, %23, %cst_10 [0] : vector<1x8x128xf32> to vector<8x128xf32>
    %25 = arith.addf %21, %24 : vector<8x128xf32>
    %c0_11 = arith.constant 0 : index
    %c0_12 = arith.constant 0 : index
    %c0_13 = arith.constant 0 : index
    %26 = vector.load %arg4[%c0_11, %c0_12, %c0_13] : memref<1x8x128xf32, #tpu.memory_space<vmem>>, vector<1x8x128xf32>
    %27 = vector.shape_cast %26 : vector<1x8x128xf32> to vector<8x128xf32>
    %28 = vector.shape_cast %25 : vector<8x128xf32> to vector<1x8x128xf32>
    tpu.vector_store %arg4[%c0_11, %c0_12, %c0_13], %28 {strides = array<i32>} : memref<1x8x128xf32, #tpu.memory_space<vmem>>, vector<1x8x128xf32>,
    %c0_14 = arith.constant 0 : index
    %c0_15 = arith.constant 0 : index
    %c0_16 = arith.constant 0 : index
    %29 = vector.load %arg5[%c0_14, %c0_15, %c0_16] : memref<1x8x128xf32, #tpu.memory_space<vmem>>, vector<1x8x128xf32>
    %30 = vector.shape_cast %29 : vector<1x8x128xf32> to vector<8x128xf32>
    %31 = arith.mulf %14, %14 : vector<8x128xf32>
    %32 = vector.shape_cast %31 : vector<8x128xf32> to vector<1x8x128xf32>
    %cst_17 = arith.constant dense<0.000000e+00> : vector<8x128xf32>
    %33 = vector.multi_reduction <add>, %32, %cst_17 [0] : vector<1x8x128xf32> to vector<8x128xf32>
    %34 = arith.addf %30, %33 : vector<8x128xf32>
    %c0_18 = arith.constant 0 : index
    %c0_19 = arith.constant 0 : index
    %c0_20 = arith.constant 0 : index
    %35 = vector.load %arg5[%c0_18, %c0_19, %c0_20] : memref<1x8x128xf32, #tpu.memory_space<vmem>>, vector<1x8x128xf32>
    %36 = vector.shape_cast %35 : vector<1x8x128xf32> to vector<8x128xf32>
    %37 = vector.shape_cast %34 : vector<8x128xf32> to vector<1x8x128xf32>
    tpu.vector_store %arg5[%c0_18, %c0_19, %c0_20], %37 {strides = array<i32>} : memref<1x8x128xf32, #tpu.memory_space<vmem>>, vector<1x8x128xf32>,
    %c0_21 = arith.constant 0 : index
    %c0_22 = arith.constant 0 : index
    %c0_23 = arith.constant 0 : index
    %38 = vector.load %arg6[%c0_21, %c0_22, %c0_23] : memref<1x8x128xf32, #tpu.memory_space<vmem>>, vector<1x8x128xf32>
    %39 = vector.shape_cast %38 : vector<1x8x128xf32> to vector<8x128xf32>
    %40 = vector.shape_cast %14 : vector<8x128xf32> to vector<1x8x128xf32>
    %cst_24 = arith.constant dense<0.000000e+00> : vector<8x128xf32>
    %41 = vector.multi_reduction <add>, %40, %cst_24 [0] : vector<1x8x128xf32> to vector<8x128xf32>
    %42 = arith.addf %39, %41 : vector<8x128xf32>
    %c0_25 = arith.constant 0 : index
    %c0_26 = arith.constant 0 : index
    %c0_27 = arith.constant 0 : index
    %43 = vector.load %arg6[%c0_25, %c0_26, %c0_27] : memref<1x8x128xf32, #tpu.memory_space<vmem>>, vector<1x8x128xf32>
    %44 = vector.shape_cast %43 : vector<1x8x128xf32> to vector<8x128xf32>
    %45 = vector.shape_cast %42 : vector<8x128xf32> to vector<1x8x128xf32>
    tpu.vector_store %arg6[%c0_25, %c0_26, %c0_27], %45 {strides = array<i32>} : memref<1x8x128xf32, #tpu.memory_space<vmem>>, vector<1x8x128xf32>,
    return
  }
  func.func @transform_0(%arg0: i32, %arg1: i32) -> (i32, i32) {
    %c1_i32 = arith.constant 1 : i32
    %0 = arith.muli %arg0, %c1_i32 : i32
    %1 = arith.addi %0, %arg1 : i32
    %c0_i32 = arith.constant 0 : i32
    %2 = arith.minsi %1, %c0_i32 : i32
    %c0_i32_0 = arith.constant 0 : i32
    %c0_i32_1 = arith.constant 0 : i32
    return %2, %c0_i32_0 : i32, i32
  }
  func.func @transform_1(%arg0: i32, %arg1: i32) -> (i32, i32) {
    %c1_i32 = arith.constant 1 : i32
    %0 = arith.muli %arg0, %c1_i32 : i32
    %1 = arith.addi %0, %arg1 : i32
    %c0_i32 = arith.constant 0 : i32
    %2 = arith.minsi %1, %c0_i32 : i32
    %c0_i32_0 = arith.constant 0 : i32
    %c0_i32_1 = arith.constant 0 : i32
    return %2, %c0_i32_0 : i32, i32
  }
  func.func @transform_2(%arg0: i32, %arg1: i32) -> (i32, i32, i32) {
    %c0_i32 = arith.constant 0 : i32
    %c0_i32_0 = arith.constant 0 : i32
    %c0_i32_1 = arith.constant 0 : i32
    return %arg0, %c0_i32, %c0_i32_0 : i32, i32, i32
  }
  func.func @transform_3(%arg0: i32, %arg1: i32) -> (i32, i32, i32) {
    %c0_i32 = arith.constant 0 : i32
    %c0_i32_0 = arith.constant 0 : i32
    %c0_i32_1 = arith.constant 0 : i32
    return %arg0, %c0_i32, %c0_i32_0 : i32, i32, i32
  }
  func.func @transform_4(%arg0: i32, %arg1: i32) -> (i32, i32, i32) {
    %c0_i32 = arith.constant 0 : i32
    %c0_i32_0 = arith.constant 0 : i32
    %c0_i32_1 = arith.constant 0 : i32
    return %arg0, %c0_i32, %c0_i32_0 : i32, i32, i32
  }
}

</mosaic_0001>

<bundles_post_ra>
// kernel: _loss1_impl.1
= control target key start
LH: loop header
LB: loop body
LE: loop exit
PB: predicated region body
PF: predicated region fallthrough
CT: control target
= control target key end

     0   :  { %s547_s15 = smov 0   ;;  %s549_s16 = smov 0   ;;  %s589_s0 = inlined_call_operand.vmem [shape: f32[8,128], index: 0, kind: input, shape index: {}]   ;;  %s590_s1 = inlined_call_operand.vmem [shape: f32[8,128], index: 1, kind: input, shape index: {}]   ;;  %s591_s2 = inlined_call_operand.vmem [shape: f32[2,8,128], index: 2, kind: output, shape index: {0}]   ;;  %s592_s3 = inlined_call_operand.vmem [shape: f32[2,8,128], index: 3, kind: output, shape index: {1}]   ;;  %s593_s4 = inlined_call_operand.vmem [shape: f32[2,8,128], index: 4, kind: output, shape index: {2}]  }
   0x1   :  { %s551_s17 = smov 0  }
   0x2 LB: > { %s27_s18 = sadd.s32 1, %s516_s16  ;;  %p458_p0 = scmp.ge.s32.totalorder %s520_s17, 1  ;;  %s520_s17 = sphi %s551_s17, %s15_s17   ;;  %s516_s16 = sphi %s549_s16, %s595_s16   ;;  %s512_s15 = sphi %s547_s15, %s594_s15  }
   0x3   : > { %p29_p1 = scmp.ge.s32.totalorder %s27_s18, 2  ;;  %p211_p2 = scmp.lt.s32.totalorder %s520_s17, 3 }
   0x5   : > { %s597_s18 = smov (%p29_p1, %s27_s18), 0  ;;  %p212_p3 = pnand %p458_p0, %p211_p2 }
   0x6   : > { %p254_p4 = scmp.lt.s32.totalorder (!%p212_p3), %s512_s15, 0  ;;  %v296_v0 = vlaneseq (!%p212_p3)  ;;  %p273_p5 = scmp.lt.s32.totalorder (!%p212_p3), %s512_s15, 1 }
   0x7   : > { %215 = sbr.rel (%p212_p3) target bundleno = 29 (0x1d), region = 28  ;;  %s470_s19 = sshll.u32 (!%p212_p3), %s512_s15, 3 }
   0x8   : > { %v297_v1 = vshrl.u32 (!%p212_p3), %v296_v0, 7  ;;  %v298_v2 = vstv (!%p212_p3), %s470_s19 }
   0xa   : > { %v299_v3 = vadd.s32 (!%p212_p3), %v298_v2, %v297_v1 }
   0xc   : > { %vm300_vm0 = vcmp.lt.s32.totalorder (!%p212_p3), %v299_v3, 8 }
   0xe   : > { %s255_s20 = scalar_select %p254_p4, %s512_s15, 0 }
   0xf   : > { %s599_s15 = smov (!%p273_p5, %s512_s15), 1 }
  0x10   : > { %s601_s20 = smov (!%p254_p4, %s255_s20), 0  ;;  %s467_s21 = sshll.u32 %s599_s15, 3 }
  0x11   : > { %s462_s22 = sshll.u32 %s601_s20, 3  ;;  %s284_s5 = scalar_lea.vmem %s593_s4, %s467_s21 }
  0x12   : > { %s259_s25 = scalar_lea.vmem %s589_s0, %s462_s22  ;;  %s269_s28 = scalar_lea.vmem %s590_s1, %s462_s22 }
  0x13   : > { %v292_v4 = vld [vmem:[%s259_s25] sm:$0xff]  ;;  %s280_s8 = scalar_lea.vmem %s592_s3, %s467_s21  ;;  %s276_s11 = scalar_lea.vmem %s591_s2, %s467_s21 }
  0x14   : > { %v293_v5 = vld [vmem:[%s269_s28] sm:$0xff]  ;;  %v301_v6 = vsel %vm300_vm0, %v292_v4, 0.0 }
  0x15   : > { %v302_v7 = vsel %vm300_vm0, %v293_v5, 0.0  ;;  %v311_v9 = vmul.f32 %v301_v6, %v301_v6  ;;  %318 = vst [vmem:[%s284_s5] sm:$0xff] %v301_v6 }
  0x16   : > { %v303_v8 = vmul.f32 0.7, %v302_v7 }
  0x17   : > { %314 = vst [vmem:[%s280_s8] sm:$0xff] %v311_v9 }
  0x18   : > { %v304_v10 = vsub.f32 %v301_v6, %v303_v8 }
  0x1a   : > { %v306_v11 = vmul.f32 %v304_v10, %v304_v10 }
  0x1c   : > { %309 = vst [vmem:[%s276_s11] sm:$0xff] %v306_v11 }
  0x1d PF: > { %s15_s17 = sadd.s32 1, %s520_s17   ;;  %s594_s15 = smov %s516_s16 }
  0x1e   : > { %p12_p6 = scmp.ge.s32.totalorder %s15_s17, 4   ;;  %s595_s16 = smov %s597_s18 }
  0x20   :  { %14 = sbr.rel (!%p12_p6) target bundleno = 2 (0x2), region = 89 }

</bundles_post_ra>
